<compile_context>
chip_gen: v7x
topology: tpu7x:2x2x1
jax: 0.10.0
libtpu: 0.0.40
codegen_flags: <defaults>
</compile_context>

<pallas_src>
import numpy as np
import jax
import jax.numpy as jnp
from jax.experimental import pallas as pl
from jax.experimental.pallas import tpu as pltpu


# dot_general dnums: contract lhs dim 1 with rhs dim 1 (transposed-RHS matmul).
_TRANS_B_DIMS = (((1,), (1,)), ((), ()))


def critic_kernel(x_ref, w1_ref, b1_ref, w2_ref, b2_ref, w3_ref, b3_ref, o_ref):
    # Per grid step (one batch tile):
    #   x  : (TILE_B, D)   natural layout, batch on sublanes
    #   h1 = relu(W1 @ x.T + b1)  -> (64, TILE_B)   (transpose folded into MXU dot)
    #   h2 = relu(W2 @ h1  + b2)  -> (64, TILE_B)
    #   out = W3 @ h2 + b3        -> (1, TILE_B)    lane-dense store
    x = x_ref[...]

    h1 = jax.lax.dot_general(w1_ref[...], x, _TRANS_B_DIMS,
                             preferred_element_type=jnp.float32) + b1_ref[...]
    h1 = jnp.maximum(h1, 0.0)                                   # f32 on the VPU

    h2 = jnp.dot(w2_ref[...], h1.astype(w2_ref.dtype),
                 preferred_element_type=jnp.float32) + b2_ref[...]
    h2 = jnp.maximum(h2, 0.0)

    o_ref[...] = jnp.dot(w3_ref[...], h2.astype(w3_ref.dtype),
                         preferred_element_type=jnp.float32) + b3_ref[...]


def critic_forward(x, params, *, tile_b=1024, compute_dtype=jnp.float32):
    """x: (B, input_dim) float32. Returns (B,) float32 (PyTorch `.squeeze()`)."""
    w1, b1, w2, b2, w3, b3 = params
    B, D = x.shape
    H = w1.shape[0]  # 64

    xc = jnp.asarray(x, compute_dtype)                     # (B, D), no transpose
    w1c = jnp.asarray(w1, compute_dtype)                   # (64, D)
    w2c = jnp.asarray(w2, compute_dtype)                   # (64, 64)
    w3c = jnp.asarray(w3, compute_dtype)                   # (1, 64)

    # Batch tiling: whole array when small; 128-aligned tiles + row padding when big.
    if B <= tile_b:
        tb, b_pad = B, B
    else:
        tb = tile_b
        assert tb % 128 == 0, "tile_b must be a multiple of 128 for lane tiling"
        b_pad = pl.cdiv(B, tb) * tb
        if b_pad != B:
            xc = jnp.pad(xc, ((0, b_pad - B), (0, 0)))
    grid = (b_pad // tb,)

    flops = 2 * B * (D * H + H * H + H)
    bytes_accessed = (int(xc.dtype.itemsize) * B * D + 4 * b_pad
                      + int(w1c.dtype.itemsize) * (D * H + H * H + H)
                      + 4 * (2 * H + 1))

    out = pl.pallas_call(
        critic_kernel,
        out_shape=jax.ShapeDtypeStruct((1, b_pad), jnp.float32),
        grid=grid,
        in_specs=[
            pl.BlockSpec((tb, D), lambda i: (i, 0)),       # x tile streams over the grid
            pl.BlockSpec(w1c.shape, lambda i: (0, 0)),     # weights/biases stay resident
            pl.BlockSpec(b1.shape, lambda i: (0, 0)),
            pl.BlockSpec(w2c.shape, lambda i: (0, 0)),
            pl.BlockSpec(b2.shape, lambda i: (0, 0)),
            pl.BlockSpec(w3c.shape, lambda i: (0, 0)),
            pl.BlockSpec(b3.shape, lambda i: (0, 0)),
        ],
        out_specs=pl.BlockSpec((1, tb), lambda i: (0, i)),  # lane-dense output row
        compiler_params=pltpu.CompilerParams(
            dimension_semantics=("parallel",),              # independent batch tiles
            vmem_limit_bytes=32 * 1024 * 1024,
        ),
        cost_estimate=pl.CostEstimate(
            flops=flops, transcendentals=0, bytes_accessed=bytes_accessed),
    )(xc, w1c, b1, w2c, b2, w3c, b3)

    out = out[:, :B]                 # drop batch padding
    return jnp.squeeze(out)          # (B,), or 0-d when B == 1, matching torch .squeeze()


def orthogonal_init(key, out_dim, in_dim):
    """Deterministic replica of nn.init.orthogonal_ (gain=1); returns (out, in)
    like nn.Linear.weight."""
    rows, cols = out_dim, in_dim
    flat = jax.random.normal(key, (max(rows, cols), min(rows, cols)), jnp.float32)
    q, r = jnp.linalg.qr(flat)
    q = q * jnp.sign(jnp.diag(r))    # sign correction as in torch
    if rows < cols:
        q = q.T
    return q[:rows, :cols].astype(jnp.float32)


def make_params(key, input_dim):
    k1, k2, k3 = jax.random.split(key, 3)
    w1 = orthogonal_init(k1, 64, input_dim)   # (64, input_dim)
    w2 = orthogonal_init(k2, 64, 64)          # (64, 64)
    w3 = orthogonal_init(k3, 1, 64)           # (1, 64)
    b1 = jnp.zeros((64, 1), jnp.float32)
    b2 = jnp.zeros((64, 1), jnp.float32)
    b3 = jnp.zeros((1, 1), jnp.float32)
    return (w1, b1, w2, b2, w3, b3)


def critic_reference(x, params):
    w1, b1, w2, b2, w3, b3 = params
    h1 = jnp.maximum(x @ w1.T + b1.T, 0.0)
    h2 = jnp.maximum(h1 @ w2.T + b2.T, 0.0)
    return jnp.squeeze(h2 @ w3.T + b3.T)


if __name__ == "__main__":
    key = jax.random.PRNGKey(0)
    kx, kp, kx2 = jax.random.split(key, 3)

    input_dim = 16   # env.observation_space.shape[0]
    params = make_params(kp, input_dim)

    # Small case: single grid step, whole-array block.
    x_small = jax.random.normal(kx, (8, input_dim), jnp.float32)
    y_small = jax.block_until_ready(critic_forward(x_small, params))
    np.testing.assert_allclose(np.asarray(y_small),
                               np.asarray(critic_reference(x_small, params)),
                               rtol=1e-4, atol=1e-4)

    # Larger case: exercises batch tiling + row padding (B not a tile multiple).
    x_big = jax.random.normal(kx2, (300, input_dim), jnp.float32)
    y_big = jax.block_until_ready(critic_forward(x_big, params, tile_b=128))
    np.testing.assert_allclose(np.asarray(y_big),
                               np.asarray(critic_reference(x_big, params)),
                               rtol=1e-4, atol=1e-4)

    print("KERNEL_OK")
</pallas_src>

<mosaic_0001>
module attributes {stable_mosaic.version = 11 : i64} {
  func.func @critic_kernel(%arg0: i32, %arg1: memref<8x16xf32, #tpu.memory_space<vmem>>, %arg2: memref<64x16xf32, #tpu.memory_space<vmem>>, %arg3: memref<64x1xf32, #tpu.memory_space<vmem>>, %arg4: memref<64x64xf32, #tpu.memory_space<vmem>>, %arg5: memref<64x1xf32, #tpu.memory_space<vmem>>, %arg6: memref<1x64xf32, #tpu.memory_space<vmem>>, %arg7: memref<1x1xf32, #tpu.memory_space<vmem>>, %arg8: memref<1x8xf32, #tpu.memory_space<vmem>>) attributes {dimension_semantics = [#tpu.dimension_semantics<parallel>], iteration_bounds = array<i64: 1>, scalar_prefetch = 0 : i64, scratch_operands = 0 : i64, tpu.core_type = #tpu.core_type<tc>, window_params = [{transform_indices = @transform_0, window_bounds = array<i64: 8, 16>}, {pipeline_mode = #tpu.pipeline_mode<synchronous>, transform_indices = @transform_1, window_bounds = array<i64: 64, 16>}, {pipeline_mode = #tpu.pipeline_mode<synchronous>, transform_indices = @transform_2, window_bounds = array<i64: 64, 1>}, {pipeline_mode = #tpu.pipeline_mode<synchronous>, transform_indices = @transform_3, window_bounds = array<i64: 64, 64>}, {pipeline_mode = #tpu.pipeline_mode<synchronous>, transform_indices = @transform_4, window_bounds = array<i64: 64, 1>}, {pipeline_mode = #tpu.pipeline_mode<synchronous>, transform_indices = @transform_5, window_bounds = array<i64: 1, 64>}, {pipeline_mode = #tpu.pipeline_mode<synchronous>, transform_indices = @transform_6, window_bounds = array<i64: 1, 1>}, {transform_indices = @transform_7, window_bounds = array<i64: 1, 8>}]} {
    %c0 = arith.constant 0 : index
    %c0_0 = arith.constant 0 : index
    %0 = vector.load %arg1[%c0, %c0_0] : memref<8x16xf32, #tpu.memory_space<vmem>>, vector<8x16xf32>
    %c0_1 = arith.constant 0 : index
    %c0_2 = arith.constant 0 : index
    %1 = vector.load %arg2[%c0_1, %c0_2] : memref<64x16xf32, #tpu.memory_space<vmem>>, vector<64x16xf32>
    %cst = arith.constant dense<0.000000e+00> : vector<64x8xf32>
    %2 = tpu.matmul %1, %0, %cst {dimension_numbers = #tpu.dot_dimension_numbers<[1], [1], [0], [0], [0, 0, 1, 0], [], []>} : vector<64x16xf32>, vector<8x16xf32>, vector<64x8xf32> -> vector<64x8xf32>
    %c0_3 = arith.constant 0 : index
    %c0_4 = arith.constant 0 : index
    %3 = vector.load %arg3[%c0_3, %c0_4] : memref<64x1xf32, #tpu.memory_space<vmem>>, vector<64x1xf32>
    %4 = vector.broadcast %3 : vector<64x1xf32> to vector<64x8xf32>
    %5 = arith.addf %2, %4 : vector<64x8xf32>
    %cst_5 = arith.constant 0.000000e+00 : f32
    %6 = vector.broadcast %cst_5 : f32 to vector<64x8xf32>
    %7 = arith.maximumf %5, %6 : vector<64x8xf32>
    %c0_6 = arith.constant 0 : index
    %c0_7 = arith.constant 0 : index
    %8 = vector.load %arg4[%c0_6, %c0_7] : memref<64x64xf32, #tpu.memory_space<vmem>>, vector<64x64xf32>
    %cst_8 = arith.constant dense<0.000000e+00> : vector<64x8xf32>
    %9 = tpu.matmul %8, %7, %cst_8 {dimension_numbers = #tpu.dot_dimension_numbers<[1], [0], [0], [1], [0, 0, 1, 1], [], []>} : vector<64x64xf32>, vector<64x8xf32>, vector<64x8xf32> -> vector<64x8xf32>
    %c0_9 = arith.constant 0 : index
    %c0_10 = arith.constant 0 : index
    %10 = vector.load %arg5[%c0_9, %c0_10] : memref<64x1xf32, #tpu.memory_space<vmem>>, vector<64x1xf32>
    %11 = vector.broadcast %10 : vector<64x1xf32> to vector<64x8xf32>
    %12 = arith.addf %9, %11 : vector<64x8xf32>
    %cst_11 = arith.constant 0.000000e+00 : f32
    %13 = vector.broadcast %cst_11 : f32 to vector<64x8xf32>
    %14 = arith.maximumf %12, %13 : vector<64x8xf32>
    %c0_12 = arith.constant 0 : index
    %c0_13 = arith.constant 0 : index
    %15 = vector.load %arg6[%c0_12, %c0_13] : memref<1x64xf32, #tpu.memory_space<vmem>>, vector<1x64xf32>
    %cst_14 = arith.constant dense<0.000000e+00> : vector<1x8xf32>
    %16 = tpu.matmul %15, %14, %cst_14 {dimension_numbers = #tpu.dot_dimension_numbers<[1], [0], [0], [1], [0, 0, 1, 1], [], []>} : vector<1x64xf32>, vector<64x8xf32>, vector<1x8xf32> -> vector<1x8xf32>
    %c0_15 = arith.constant 0 : index
    %c0_16 = arith.constant 0 : index
    %17 = vector.load %arg7[%c0_15, %c0_16] : memref<1x1xf32, #tpu.memory_space<vmem>>, vector<1x1xf32>
    %18 = vector.broadcast %17 : vector<1x1xf32> to vector<1x8xf32>
    %19 = arith.addf %16, %18 : vector<1x8xf32>
    %c0_17 = arith.constant 0 : index
    %c0_18 = arith.constant 0 : index
    %20 = vector.load %arg8[%c0_17, %c0_18] : memref<1x8xf32, #tpu.memory_space<vmem>>, vector<1x8xf32>
    tpu.vector_store %arg8[%c0_17, %c0_18], %19 {strides = array<i32>} : memref<1x8xf32, #tpu.memory_space<vmem>>, vector<1x8xf32>,
    return
  }
  func.func @transform_0(%arg0: i32) -> (i32, i32) {
    %c0_i32 = arith.constant 0 : i32
    %c0_i32_0 = arith.constant 0 : i32
    return %arg0, %c0_i32 : i32, i32
  }
  func.func @transform_1(%arg0: i32) -> (i32, i32) {
    %c0_i32 = arith.constant 0 : i32
    %c0_i32_0 = arith.constant 0 : i32
    %c0_i32_1 = arith.constant 0 : i32
    return %c0_i32, %c0_i32_0 : i32, i32
  }
  func.func @transform_2(%arg0: i32) -> (i32, i32) {
    %c0_i32 = arith.constant 0 : i32
    %c0_i32_0 = arith.constant 0 : i32
    %c0_i32_1 = arith.constant 0 : i32
    return %c0_i32, %c0_i32_0 : i32, i32
  }
  func.func @transform_3(%arg0: i32) -> (i32, i32) {
    %c0_i32 = arith.constant 0 : i32
    %c0_i32_0 = arith.constant 0 : i32
    %c0_i32_1 = arith.constant 0 : i32
    return %c0_i32, %c0_i32_0 : i32, i32
  }
  func.func @transform_4(%arg0: i32) -> (i32, i32) {
    %c0_i32 = arith.constant 0 : i32
    %c0_i32_0 = arith.constant 0 : i32
    %c0_i32_1 = arith.constant 0 : i32
    return %c0_i32, %c0_i32_0 : i32, i32
  }
  func.func @transform_5(%arg0: i32) -> (i32, i32) {
    %c0_i32 = arith.constant 0 : i32
    %c0_i32_0 = arith.constant 0 : i32
    %c0_i32_1 = arith.constant 0 : i32
    return %c0_i32, %c0_i32_0 : i32, i32
  }
  func.func @transform_6(%arg0: i32) -> (i32, i32) {
    %c0_i32 = arith.constant 0 : i32
    %c0_i32_0 = arith.constant 0 : i32
    %c0_i32_1 = arith.constant 0 : i32
    return %c0_i32, %c0_i32_0 : i32, i32
  }
  func.func @transform_7(%arg0: i32) -> (i32, i32) {
    %c0_i32 = arith.constant 0 : i32
    %c0_i32_0 = arith.constant 0 : i32
    return %c0_i32, %arg0 : i32, i32
  }
}

</mosaic_0001>

<bundles_post_ra>
// kernel: tpu_custom_call.1
= control target key start
LH: loop header
LB: loop body
LE: loop exit
PB: predicated region body
PF: predicated region fallthrough
CT: control target
= control target key end

     0   :  { %s874_s0 = inlined_call_operand.vmem [shape: f32[8,16], index: 0, kind: input, shape index: {}]   ;;  %s875_s1 = inlined_call_operand.vmem [shape: f32[64,16], index: 1, kind: input, shape index: {}]   ;;  %s876_s2 = inlined_call_operand.vmem [shape: f32[64,1], index: 2, kind: input, shape index: {}]   ;;  %s877_s3 = inlined_call_operand.vmem [shape: f32[64,64], index: 3, kind: input, shape index: {}]   ;;  %s878_s4 = inlined_call_operand.vmem [shape: f32[64,1], index: 4, kind: input, shape index: {}]   ;;  %s879_s5 = inlined_call_operand.vmem [shape: f32[1,64], index: 5, kind: input, shape index: {}]   ;;  %s880_s6 = inlined_call_operand.<no memory space> [shape: f32[1,1], index: 6, kind: input, shape index: {}]   ;;  %s881_s7 = inlined_call_operand.hbm [shape: f32[1,8], index: 7, kind: output, shape index: {}]  }
   0x1   :  { %v12_v0 = vstv %s880_s6 }
   0x2   :  { %13 = vst [vmem:[#allocation2] sm:$0x1] %v12_v0 }
   0x3   :  { %v29_v1 = vld [vmem:[%s874_s0] sm:$0xff]  ;;  %vm86_vm0 = vcmask 130048   ;;  %v31_v3 = vld [vmem:[%s875_s1 + $0x8] sm:$0xff]  ;;  %v693_v4 = vmov 0   ;;  %v32_v5 = vld [vmem:[%s875_s1 + $0x10] sm:$0xff] }
   0x4   :  { %v30_v2 = vld [vmem:[%s875_s1] sm:$0xff]  ;;  %573 = vmatprep.subr.msk.mxu0 %vm86_vm0, %v29_v1  ;;  %667 = vset.pattern.permute.xlu0 %v693_v4  ;;  %v40_v7 = vld [vmem:[%s876_s2 + $0x10] sm:$0xff]  ;;  %v39_v8 = vld [vmem:[%s876_s2 + $0x8] sm:$0xff] }
   0x5   :  { %575 = vmatprep.mubr.msk.f32.mxu0 %vm86_vm0, %v30_v2  ;;  %574 = vmatpush3.xpose.msk.msra.mxu0 %vm86_vm0, %v29_v1  ;;  %v38_v6 = vld [vmem:[%s876_s2] sm:$0xff]  ;;  %v41_v9 = vld [vmem:[%s876_s2 + $0x18] sm:$0xff] }
   0x6   :  { %668 = vset.pattern.permute.xlu1 %v693_v4  ;;  %48 = vperm.xlu0 %667, %v38_v6   ;;  %v33_v10 = vld [vmem:[%s875_s1 + $0x18] sm:$0xff]  ;;  %v34_v11 = vld [vmem:[%s875_s1 + $0x20] sm:$0xff] }
   0x7   :  { %58 = vperm.xlu1 %668, %v40_v7  }
   0x8   :  { %576 = vmatmul.mubr.msk.f32.vlgmr.msra.gmra.mrb[0].mxu0 %vm86_vm0, %v31_v3 }
   0x9   :  { %578 = vmatprep.mubr.msk.f32.mxu0 %vm86_vm0, %v32_v5 }
   0xa   :  { %53 = vperm.xlu0 %667, %v39_v8  }
   0xb   :  { %63 = vperm.xlu1 %668, %v41_v9  }
   0xc   :  { %14 = vsyncpa [#allocation4], 0  ;;  %579 = vmatmul.mubr.msk.f32.gmra.mrb[2].mxu0 %vm86_vm0, %v33_v10  ;;  %v42_v12 = vld [vmem:[%s876_s2 + $0x20] sm:$0xff]  ;;  %v43_v13 = vld [vmem:[%s876_s2 + $0x28] sm:$0xff]  ;;  %vm283_vm1 = vcmask 523264   ;;  %v694_v8 = vmov 0.0|0.0  }
   0xd   :  { %581 = vmatprep.mubr.msk.f32.mxu0 %vm86_vm0, %v34_v11  ;;  %v35_v14 = vld [vmem:[%s875_s1 + $0x28] sm:$0xff]  ;;  %v36_v15 = vld [vmem:[%s875_s1 + $0x30] sm:$0xff]  ;;  %v45_v17 = vld [vmem:[%s876_s2 + $0x38] sm:$0xff]  ;;  %650 = vmatprep.subr.bf16.mxu0 %v694_v8  ;;  %vm695_vm2 = vmmov 0   ;;  %v696_v9 = vmov 0.0   ;;  %s697_s14 = smov [#allocation3]  }
   0xe   :  { %68 = vperm.xlu0 %667, %v42_v12   ;;  %v44_v16 = vld [vmem:[%s876_s2 + $0x30] sm:$0xff]  ;;  %v37_v18 = vld [vmem:[%s875_s1 + $0x38] sm:$0xff]  ;;  %v235_v19 = vld [vmem:[%s878_s4] sm:$0xff]  ;;  %s513_s15 = sshll.u32 %s697_s14, 4  ;;  %vm505_vm3 = vcmask 57344   ;;  %s514_s15 = int_to_ptr.vmem [resolvable:$true] %s513_s15 }
   0xf   :  { %73 = vperm.xlu1 %668, %v43_v13   ;;  %v236_v20 = vld [vmem:[%s878_s4 + $0x8] sm:$0xff]  ;;  %v237_v21 = vld [vmem:[%s878_s4 + $0x10] sm:$0xff]  ;;  %v238_v22 = vld [vmem:[%s878_s4 + $0x18] sm:$0xff]  ;;  %s669_s1 = scalar_lea.vmem %s514_s15, 16  ;;  %s673_s16 = scalar_lea.vmem %s514_s15, 32 }
  0x10   :  { %582 = vmatmul.mubr.msk.f32.gmra.mrb[4].mxu0 %vm86_vm0, %v35_v14  ;;  %v239_v23 = vld [vmem:[%s878_s4 + $0x20] sm:$0xff]  ;;  %v240_v24 = vld [vmem:[%s878_s4 + $0x28] sm:$0xff]  ;;  %v241_v25 = vld [vmem:[%s878_s4 + $0x30] sm:$0xff]  ;;  %p670_p0 = scmp.ne.s32.totalorder %s514_s15, %s669_s1  ;;  %p674_p1 = scmp.lt.s32.totalorder %s514_s15, %s514_s15 }
  0x11   :  { %584 = vmatprep.mubr.msk.f32.mxu0 %vm86_vm0, %v36_v15  ;;  %v242_v26 = vld [vmem:[%s878_s4 + $0x38] sm:$0xff]  ;;  %v422_v27 = vld [vmem:[#allocation2] sm:$0x1]  ;;  %v228_v1 = vld [vmem:[%s877_s3 + $0x8] sm:$0xff]  ;;  %p675_p2 = scmp.lt.s32.totalorder %s673_s16, %s669_s1 }
  0x12   :  { %78 = vperm.xlu0 %667, %v44_v16   ;;  %v227_v28 = vld [vmem:[%s877_s3] sm:$0xff]  ;;  %v229_v2 = vld [vmem:[%s877_s3 + $0x10] sm:$0xff]  ;;  %v230_v3 = vld [vmem:[%s877_s3 + $0x18] sm:$0xff] }
  0x13   :  { %83 = vperm.xlu1 %668, %v45_v17   ;;  %603 = vmatprep.mubr.msk.f32.mxu1 %vm283_vm1, %v227_v28  ;;  %v231_v4 = vld [vmem:[%s877_s3 + $0x20] sm:$0xff]  ;;  %v232_v5 = vld [vmem:[%s877_s3 + $0x28] sm:$0xff]  ;;  %v233_v6 = vld [vmem:[%s877_s3 + $0x30] sm:$0xff]  ;;  %p676_p3 = por %p675_p2, %p674_p1 }
  0x14   :  { %585 = vmatmul.mubr.msk.f32.gmra.mrb[6].mxu0 %vm86_vm0, %v37_v18  ;;  %v234_v7 = vld [vmem:[%s877_s3 + $0x38] sm:$0xff] }
  0x15   :  { %631 = vmatprep.mubr.msk.f32.mxu0 %vm695_vm2, %v696_v9  ;;  %p677_p4 = pnand %p676_p3, %p670_p0 }
  0x16   :  { %245 = vperm.xlu0 %667, %v235_v19  }
  0x17   :  { %250 = vperm.xlu1 %668, %v236_v20  }
  0x1a   :  { %255 = vperm.xlu0 %667, %v237_v21  }
  0x1b   :  { %260 = vperm.xlu1 %668, %v238_v22  }
  0x1e   :  { %265 = vperm.xlu0 %667, %v239_v23  }
  0x1f   :  { %270 = vperm.xlu1 %668, %v240_v24  }
  0x22   :  { %275 = vperm.xlu0 %667, %v241_v25  }
  0x23   :  { %280 = vperm.xlu1 %668, %v242_v26  }
  0x26   :  { %425 = vperm.xlu0 %667, %v422_v27  }
  0x85   :  { %v49_v29 = vpop.permute.xlu0 %48 }
  0x86   :  { %v59_v30 = vpop.permute.xlu1 %58 }
  0x89   :  { %v54_v31 = vpop.permute.xlu0 %53 }
  0x8a   :  { %v64_v32 = vpop.permute.xlu1 %63 }
  0x8d   :  { %v69_v45 = vpop.permute.xlu0 %68 }
  0x8e   :  { %v74_v42 = vpop.permute.xlu1 %73 }
  0x91   :  { %v79_v57 = vpop.permute.xlu0 %78 }
  0x92   :  { %v84_v54 = vpop.permute.xlu1 %83 }
  0x95   :  { %v246_v11 = vpop.permute.xlu0 %245 }
  0x96   :  { %v251_v10 = vpop.permute.xlu1 %250 }
  0x99   :  { %v256_v14 = vpop.permute.xlu0 %255 }
  0x9a   :  { %v261_v12 = vpop.permute.xlu1 %260 }
  0x9d   :  { %v266_v26 = vpop.permute.xlu0 %265 }
  0x9e   :  { %v271_v23 = vpop.permute.xlu1 %270 }
  0xdb   :  { %v577_v33 = vpop.f32.mrb[0].mxu0 }
  0xdc   :  { %v186_v34 = vadd.f32 %v577_v33, %v54_v31  ;;  %v180_v35 = vpop.f32.mrb[1].mxu0 }
  0xdd   :  { %v181_v36 = vadd.f32 %v180_v35, %v49_v29  ;;  %v281_v35 = vpop.permute.xlu1 %280 }
  0xde   :  { %v220_v37 = vmax.f32 %v186_v34, 0.0 }
  0xdf   :  { %v219_v38 = vmax.f32 %v181_v36, 0.0  ;;  %v580_v39 = vpop.f32.mrb[2].mxu0 }
  0xe0   :  { %v196_v40 = vadd.f32 %v580_v39, %v64_v32  ;;  %v190_v41 = vpop.f32.mrb[3].mxu0 }
  0xe1   :  { %v191_v43 = vadd.f32 %v190_v41, %v59_v30  ;;  %v634_v44 = vpack.c.bf16 %v220_v37, %v219_v38  ;;  %v276_v38 = vpop.permute.xlu0 %275 }
  0xe2   :  { %v222_v46 = vmax.f32 %v196_v40, 0.0 }
  0xe3   :  { %v221_v47 = vmax.f32 %v191_v43, 0.0  ;;  %v583_v48 = vpop.f32.mrb[4].mxu0  ;;  %635 = vmatprep.subr.bf16.mxu1 %v634_v44 }
  0xe4   :  { %v206_v49 = vadd.f32 %v583_v48, %v74_v42  ;;  %v200_v50 = vpop.f32.mrb[5].mxu0  ;;  %637 = vmatpush3.bf16.msra.mxu1 %v634_v44 }
  0xe5   :  { %v638_v51 = vpack.c.bf16 %v222_v46, %v221_v47  ;;  %v201_v52 = vadd.f32 %v200_v50, %v69_v45  ;;  %v421_v46 = vld [vmem:[%s879_s5] sm:$0x1]  ;;  %v428_v47 = vlaneseq  ;;  %v426_v50 = vpop.permute.xlu0 %425 }
  0xe6   :  { %v224_v53 = vmax.f32 %v206_v49, 0.0 }
  0xe7   :  { %v223_v55 = vmax.f32 %v201_v52, 0.0  ;;  %v586_v56 = vpop.f32.mrb[6].mxu0  ;;  %639 = vmatprep.subr.bf16.mxu1 %v638_v51  ;;  %v429_v48 = vshrl.u32 %v428_v47, 7 }
  0xe8   :  { %v216_v58 = vadd.f32 %v586_v56, %v84_v54  ;;  %v210_v59 = vpop.f32.mrb[7].mxu0  ;;  %641 = vmatpush3.bf16.msra.mxu1 %v638_v51 }
  0xe9   :  { %v642_v60 = vpack.c.bf16 %v224_v53, %v223_v55  ;;  %v211_v61 = vadd.f32 %v210_v59, %v79_v57  ;;  %v430_v49 = vsub.s32 0, %v429_v48 }
  0xea   :  { %v226_v62 = vmax.f32 %v216_v58, 0.0 }
  0xeb   :  { %v225_v63 = vmax.f32 %v211_v61, 0.0  ;;  %643 = vmatprep.subr.bf16.mxu1 %v642_v60  ;;  %v431_v51 = vrot.slane %v426_v50, %v430_v49 }
  0xec   :  { %645 = vmatpush3.bf16.msra.mxu1 %v642_v60 }
  0xed   :  { %v646_v0 = vpack.c.bf16 %v226_v62, %v225_v63 }
  0xef   :  { %647 = vmatprep.subr.bf16.mxu1 %v646_v0 }
  0xf0   :  { %649 = vmatpush3.bf16.msra.mxu1 %v646_v0 }
  0xf3   :  { %604 = vmatmul.mubr.msk.f32.vlgmr.msra.gmra.mrb[0].mxu1 %vm283_vm1, %v228_v1 }
  0xf4   :  { %606 = vmatprep.mubr.msk.f32.mxu1 %vm283_vm1, %v229_v2 }
  0xf7   :  { %607 = vmatmul.mubr.msk.f32.gmra.mrb[2].mxu1 %vm283_vm1, %v230_v3 }
  0xf8   :  { %609 = vmatprep.mubr.msk.f32.mxu1 %vm283_vm1, %v231_v4 }
  0xfb   :  { %610 = vmatmul.mubr.msk.f32.gmra.mrb[4].mxu1 %vm283_vm1, %v232_v5 }
  0xfc   :  { %612 = vmatprep.mubr.msk.f32.mxu1 %vm283_vm1, %v233_v6 }
  0xff   :  { %613 = vmatmul.mubr.msk.f32.gmra.mrb[6].mxu1 %vm283_vm1, %v234_v7 }
 0x1c6   :  { %v605_v13 = vpop.f32.mrb[0].mxu1 }
 0x1c7   :  { %v380_v15 = vadd.f32 %v605_v13, %v251_v10  ;;  %v374_v16 = vpop.f32.mrb[1].mxu1 }
 0x1c8   :  { %v375_v17 = vadd.f32 %v374_v16, %v246_v11 }
 0x1c9   :  { %v414_v18 = vmax.f32 %v380_v15, 0.0 }
 0x1ca   :  { %v413_v19 = vmax.f32 %v375_v17, 0.0  ;;  %v608_v20 = vpop.f32.mrb[2].mxu1 }
 0x1cb   :  { %v390_v21 = vadd.f32 %v608_v20, %v261_v12  ;;  %v384_v22 = vpop.f32.mrb[3].mxu1 }
 0x1cc   :  { %v651_v24 = vpack.c.bf16 %v414_v18, %v413_v19  ;;  %v385_v25 = vadd.f32 %v384_v22, %v256_v14 }
 0x1cd   :  { %v416_v27 = vmax.f32 %v390_v21, 0.0 }
 0x1ce   :  { %v415_v28 = vmax.f32 %v385_v25, 0.0  ;;  %v611_v29 = vpop.f32.mrb[4].mxu1  ;;  %652 = vmatpush3.bf16.msra.mxu0 %v651_v24 }
 0x1cf   :  { %v400_v30 = vadd.f32 %v611_v29, %v271_v23  ;;  %v394_v31 = vpop.f32.mrb[5].mxu1  ;;  %653 = vmatprep.subr.bf16.mxu0 %v694_v8 }
 0x1d0   :  { %v654_v32 = vpack.c.bf16 %v416_v27, %v415_v28  ;;  %v395_v33 = vadd.f32 %v394_v31, %v266_v26 }
 0x1d1   :  { %v418_v34 = vmax.f32 %v400_v30, 0.0 }
 0x1d2   :  { %v417_v36 = vmax.f32 %v395_v33, 0.0  ;;  %v614_v37 = vpop.f32.mrb[6].mxu1  ;;  %655 = vmatpush3.bf16.msra.mxu0 %v654_v32 }
 0x1d3   :  { %v410_v39 = vadd.f32 %v614_v37, %v281_v35  ;;  %v404_v40 = vpop.f32.mrb[7].mxu1  ;;  %656 = vmatprep.subr.bf16.mxu0 %v694_v8 }
 0x1d4   :  { %v657_v41 = vpack.c.bf16 %v418_v34, %v417_v36  ;;  %v405_v42 = vadd.f32 %v404_v40, %v276_v38 }
 0x1d5   :  { %v420_v43 = vmax.f32 %v410_v39, 0.0 }
 0x1d6   :  { %v419_v44 = vmax.f32 %v405_v42, 0.0  ;;  %658 = vmatpush3.bf16.msra.mxu0 %v657_v41 }
 0x1d7   :  { %659 = vmatprep.subr.bf16.mxu0 %v694_v8 }
 0x1d8   :  { %v660_v45 = vpack.c.bf16 %v420_v43, %v419_v44 }
 0x1da   :  { %661 = vmatpush3.bf16.msra.mxu0 %v660_v45 }
 0x1dd   :  { %632 = vmatmul.mubr.msk.f32.vlgmr.msra.gmra.mrb[8].mxu0 %vm283_vm1, %v421_v46 }
 0x2b0   :  { %v501_v52 = vpop.f32.mrb[8].mxu0 }
 0x2b1   :  { %v502_v53 = vadd.f32 %v501_v52, %v431_v51  ;;  %v633_v54 = vpop.f32.mrb[9].mxu0 }
 0x2b3   :  { %506 = vst.msk [vmem:[#allocation3] sm:$0x1] %vm505_vm3, %v502_v53 }
 0x2b4   :  { %680 = shalt.err (!%p677_p4)
}
 0x2b5   :  { %s681_s18 = scalar_lea.hbm %s881_s7, 16 }
 0x2b6   :  { %p682_p5 = scmp.ne.s32.totalorder %s881_s7, %s681_s18  ;;  %p685_p6 = scmp.lt.u32.totalorder %s681_s18, %s881_s7 }
 0x2b8   :  { %p687_p7 = pnand %p685_p6, %p682_p5 }
 0x2ba   :  { %690 = shalt.err (!%p687_p7)
}
 0x2bb   :  { %516 = dma.vmem_to_hbm [thread:$0]  %s514_s15, 16, %s881_s7, [#allocation4]  }
 0x2bc   :  { %691 = dma.done.wait [#allocation4], 16  }
 0x2bd   :  { %692 = vsyncadd [#allocation4], 4294967280 }
 0x2be   :  { %520 = vsyncpa [#allocation4], 1 }

</bundles_post_ra>
